<compile_context>
chip_gen: v5e
topology: v5e:2x2
jax: 0.10.0
libtpu: 0.0.40
codegen_flags: <defaults>
</compile_context>

<pallas_src>
import jax
import jax.numpy as jnp
from jax.experimental import pallas as pl
from jax.experimental.pallas import tpu as pltpu


def _round_up(x, m):
    return ((x + m - 1) // m) * m


def mlp_embed_kernel(ids_ref,            # VMEM (TB, S)        int32
                     mask_ref,           # VMEM (TB, S)        f32 (0/1)
                     emb_ref,            # VMEM (V_pad, E_pad) f32  -- resident
                     w1_ref, b1_ref,     # VMEM (E_pad, H_pad), (1, H_pad) -- resident
                     w2_ref, b2_ref,     # VMEM (H_pad, O_pad), (1, O_pad) -- resident
                     out_ref):           # VMEM (TB, O_pad)    f32
    TB, S = ids_ref.shape
    V_pad = emb_ref.shape[0]

    ids = ids_ref[...]                   # (TB, S) int32
    mask = mask_ref[...]                 # (TB, S) f32

    # --- fused gather + masked sum pooling as ONE MXU matmul.
    # weights[b, v] = sum_s mask[b, s] * (ids[b, s] == v); repeated tokens sum exactly.
    vocab_iota = jax.lax.broadcasted_iota(jnp.int32, (TB, S, V_pad), 2)
    onehot = (ids[:, :, None] == vocab_iota).astype(jnp.float32)       # (TB, S, V_pad)
    weights = jnp.sum(onehot * mask[:, :, None], axis=1)               # (TB, V_pad)

    pooled_sum = jnp.dot(weights, emb_ref[...],
                         preferred_element_type=jnp.float32)           # (TB, E_pad)
    count = jnp.maximum(jnp.sum(mask, axis=1, keepdims=True), 1.0)     # clamp(min=1)
    pooled = pooled_sum / count                                        # (TB, E_pad)

    # --- fc1 + ReLU  (dropout p=0.1 is identity in eval mode)
    h = jnp.dot(pooled, w1_ref[...], preferred_element_type=jnp.float32) + b1_ref[...]
    h = jnp.maximum(h, 0.0)                                            # (TB, H_pad)
    # TODO(synk): training-mode dropout (p=0.1) not implemented; eval-mode identity used.

    # --- fc2 (lane+sublane-dense padded store; wrapper slices back to [B, O])
    out_ref[...] = jnp.dot(h, w2_ref[...], preferred_element_type=jnp.float32) + b2_ref[...]


def mlp_with_embedding_forward(input_ids, attention_mask, params, *, tb=8):
    """input_ids: [B, S] int, attention_mask: [B, S] int -> logits [B, O]."""
    emb_table = params["embedding"]          # [V, E], row 0 zeroed (padding_idx=0)
    w1, b1 = params["w1"], params["b1"]      # [E, H], [1, H]
    w2, b2 = params["w2"], params["b2"]      # [H, O], [1, O]

    B, S = input_ids.shape
    V, E = emb_table.shape
    H = w1.shape[1]
    O = w2.shape[1]

    TB = tb                                  # rows per grid step (f32 sublane multiple)
    B_pad = _round_up(max(B, TB), TB)
    V_pad = _round_up(V, 128)
    E_pad = _round_up(E, 128)
    H_pad = _round_up(H, 128)
    O_pad = _round_up(O, 128)

    # Zero-padding all dims is exact w.r.t. the unpadded math (extra rows/cols are 0,
    # padded batch rows have mask=0 and are sliced off).
    embp = jnp.zeros((V_pad, E_pad), jnp.float32).at[:V, :E].set(emb_table)
    w1p = jnp.zeros((E_pad, H_pad), jnp.float32).at[:E, :H].set(w1)
    b1p = jnp.zeros((1, H_pad), jnp.float32).at[:, :H].set(b1)
    w2p = jnp.zeros((H_pad, O_pad), jnp.float32).at[:H, :O].set(w2)
    b2p = jnp.zeros((1, O_pad), jnp.float32).at[:, :O].set(b2)

    ids = jnp.zeros((B_pad, S), jnp.int32).at[:B].set(input_ids.astype(jnp.int32))
    maskf = jnp.zeros((B_pad, S), jnp.float32).at[:B].set(attention_mask.astype(jnp.float32))

    grid_spec = pltpu.PrefetchScalarGridSpec(
        num_scalar_prefetch=0,
        grid=(B_pad // TB,),
        in_specs=[
            pl.BlockSpec((TB, S), lambda i: (i, 0)),              # ids tile
            pl.BlockSpec((TB, S), lambda i: (i, 0)),              # mask tile
            pl.BlockSpec((V_pad, E_pad), lambda i: (0, 0)),       # embedding table, resident
            pl.BlockSpec((E_pad, H_pad), lambda i: (0, 0)),       # w1, resident
            pl.BlockSpec((1, H_pad), lambda i: (0, 0)),           # b1, resident
            pl.BlockSpec((H_pad, O_pad), lambda i: (0, 0)),       # w2, resident
            pl.BlockSpec((1, O_pad), lambda i: (0, 0)),           # b2, resident
        ],
        out_specs=pl.BlockSpec((TB, O_pad), lambda i: (i, 0)),
    )

    out = pl.pallas_call(
        mlp_embed_kernel,
        out_shape=jax.ShapeDtypeStruct((B_pad, O_pad), jnp.float32),
        grid_spec=grid_spec,
        compiler_params=pltpu.CompilerParams(
            dimension_semantics=("parallel",),   # batch-tile axis: megacore / 2-TC split
        ),
    )(ids, maskf, embp, w1p, b1p, w2p, b2p)

    return out[:B, :O]


def init_params(key, vocab_size, embed_dim, hidden_dim, output_dim):
    k_emb, k_w1, k_b1, k_w2, k_b2 = jax.random.split(key, 5)
    emb = jax.random.normal(k_emb, (vocab_size, embed_dim), jnp.float32) * 0.1
    emb = emb.at[0].set(0.0)  # padding_idx=0
    w1 = jax.random.normal(k_w1, (embed_dim, hidden_dim), jnp.float32) * 0.1
    b1 = jax.random.normal(k_b1, (1, hidden_dim), jnp.float32) * 0.01
    w2 = jax.random.normal(k_w2, (hidden_dim, output_dim), jnp.float32) * 0.1
    b2 = jax.random.normal(k_b2, (1, output_dim), jnp.float32) * 0.01
    return {"embedding": emb, "w1": w1, "b1": b1, "w2": w2, "b2": b2}


if __name__ == "__main__":
    VOCAB, EMBED, HIDDEN, OUT = 50, 16, 32, 4
    B, S = 2, 8

    key = jax.random.PRNGKey(0)
    k_params, k_ids, k_len = jax.random.split(key, 3)

    params = init_params(k_params, VOCAB, EMBED, HIDDEN, OUT)

    # deterministic example inputs: token ids in [1, VOCAB), mask with trailing padding
    input_ids = jax.random.randint(k_ids, (B, S), 1, VOCAB, dtype=jnp.int32)
    lengths = jax.random.randint(k_len, (B,), 3, S + 1, dtype=jnp.int32)
    attention_mask = (jnp.arange(S)[None, :] < lengths[:, None]).astype(jnp.int32)
    input_ids = input_ids * attention_mask  # padded positions -> id 0 (padding_idx)

    logits = mlp_with_embedding_forward(input_ids, attention_mask, params)
    jax.block_until_ready(logits)

    # sanity check against a pure-JAX reference of the same math
    emb = jnp.take(params["embedding"], input_ids, axis=0)
    m = attention_mask.astype(jnp.float32)[:, :, None]
    pooled = jnp.sum(emb * m, axis=1) / jnp.maximum(jnp.sum(m, axis=1), 1.0)
    h = jnp.maximum(pooled @ params["w1"] + params["b1"], 0.0)
    ref = h @ params["w2"] + params["b2"]
    assert logits.shape == ref.shape
    assert jnp.allclose(logits, ref, atol=1e-5, rtol=1e-5)

    print("KERNEL_OK")
</pallas_src>

<mosaic_0001>
module attributes {stable_mosaic.version = 11 : i64} {
  func.func @mlp_embed_kernel(%arg0: i32, %arg1: memref<8x8xi32, #tpu.memory_space<vmem>>, %arg2: memref<8x8xf32, #tpu.memory_space<vmem>>, %arg3: memref<128x128xf32, #tpu.memory_space<vmem>>, %arg4: memref<128x128xf32, #tpu.memory_space<vmem>>, %arg5: memref<1x128xf32, #tpu.memory_space<vmem>>, %arg6: memref<128x128xf32, #tpu.memory_space<vmem>>, %arg7: memref<1x128xf32, #tpu.memory_space<vmem>>, %arg8: memref<8x128xf32, #tpu.memory_space<vmem>>) attributes {dimension_semantics = [#tpu.dimension_semantics<parallel>], iteration_bounds = array<i64: 1>, scalar_prefetch = 0 : i64, scratch_operands = 0 : i64, tpu.core_type = #tpu.core_type<tc>, window_params = [{transform_indices = @transform_0, window_bounds = array<i64: 8, 8>}, {transform_indices = @transform_1, window_bounds = array<i64: 8, 8>}, {pipeline_mode = #tpu.pipeline_mode<synchronous>, transform_indices = @transform_2, window_bounds = array<i64: 128, 128>}, {pipeline_mode = #tpu.pipeline_mode<synchronous>, transform_indices = @transform_3, window_bounds = array<i64: 128, 128>}, {pipeline_mode = #tpu.pipeline_mode<synchronous>, transform_indices = @transform_4, window_bounds = array<i64: 1, 128>}, {pipeline_mode = #tpu.pipeline_mode<synchronous>, transform_indices = @transform_5, window_bounds = array<i64: 128, 128>}, {pipeline_mode = #tpu.pipeline_mode<synchronous>, transform_indices = @transform_6, window_bounds = array<i64: 1, 128>}, {transform_indices = @transform_7, window_bounds = array<i64: 8, 128>}]} {
    %c0 = arith.constant 0 : index
    %c0_0 = arith.constant 0 : index
    %0 = vector.load %arg1[%c0, %c0_0] : memref<8x8xi32, #tpu.memory_space<vmem>>, vector<8x8xi32>
    %c0_1 = arith.constant 0 : index
    %c0_2 = arith.constant 0 : index
    %1 = vector.load %arg2[%c0_1, %c0_2] : memref<8x8xf32, #tpu.memory_space<vmem>>, vector<8x8xf32>
    %2 = tpu.iota {dimensions = array<i32: 2>} : vector<8x8x128xi32>
    %3 = vector.shape_cast %0 : vector<8x8xi32> to vector<8x8x1xi32>
    %4 = vector.broadcast %3 : vector<8x8x1xi32> to vector<8x8x128xi32>
    %5 = arith.cmpi eq, %4, %2 : vector<8x8x128xi32>
    %6 = arith.extui %5 : vector<8x8x128xi1> to vector<8x8x128xi32>
    %7 = arith.sitofp %6 : vector<8x8x128xi32> to vector<8x8x128xf32>
    %8 = vector.shape_cast %1 : vector<8x8xf32> to vector<8x8x1xf32>
    %9 = vector.broadcast %8 : vector<8x8x1xf32> to vector<8x8x128xf32>
    %10 = arith.mulf %7, %9 : vector<8x8x128xf32>
    %cst = arith.constant dense<0.000000e+00> : vector<8x128xf32>
    %11 = vector.multi_reduction <add>, %10, %cst [1] : vector<8x8x128xf32> to vector<8x128xf32>
    %c0_3 = arith.constant 0 : index
    %c0_4 = arith.constant 0 : index
    %12 = vector.load %arg3[%c0_3, %c0_4] : memref<128x128xf32, #tpu.memory_space<vmem>>, vector<128x128xf32>
    %cst_5 = arith.constant dense<0.000000e+00> : vector<8x128xf32>
    %13 = tpu.matmul %11, %12, %cst_5 {dimension_numbers = #tpu.dot_dimension_numbers<[1], [0], [0], [1], [0, 0, 1, 1], [], []>} : vector<8x128xf32>, vector<128x128xf32>, vector<8x128xf32> -> vector<8x128xf32>
    %cst_6 = arith.constant dense<0.000000e+00> : vector<8xf32>
    %14 = vector.multi_reduction <add>, %1, %cst_6 [1] : vector<8x8xf32> to vector<8xf32>
    %15 = vector.shape_cast %14 : vector<8xf32> to vector<8x1xf32>
    %cst_7 = arith.constant 1.000000e+00 : f32
    %16 = vector.broadcast %cst_7 : f32 to vector<8x1xf32>
    %17 = arith.maximumf %15, %16 : vector<8x1xf32>
    %18 = vector.broadcast %17 : vector<8x1xf32> to vector<8x128xf32>
    %19 = arith.divf %13, %18 : vector<8x128xf32>
    %c0_8 = arith.constant 0 : index
    %c0_9 = arith.constant 0 : index
    %20 = vector.load %arg4[%c0_8, %c0_9] : memref<128x128xf32, #tpu.memory_space<vmem>>, vector<128x128xf32>
    %cst_10 = arith.constant dense<0.000000e+00> : vector<8x128xf32>
    %21 = tpu.matmul %19, %20, %cst_10 {dimension_numbers = #tpu.dot_dimension_numbers<[1], [0], [0], [1], [0, 0, 1, 1], [], []>} : vector<8x128xf32>, vector<128x128xf32>, vector<8x128xf32> -> vector<8x128xf32>
    %c0_11 = arith.constant 0 : index
    %c0_12 = arith.constant 0 : index
    %22 = vector.load %arg5[%c0_11, %c0_12] : memref<1x128xf32, #tpu.memory_space<vmem>>, vector<1x128xf32>
    %23 = vector.broadcast %22 : vector<1x128xf32> to vector<8x128xf32>
    %24 = arith.addf %21, %23 : vector<8x128xf32>
    %cst_13 = arith.constant 0.000000e+00 : f32
    %25 = vector.broadcast %cst_13 : f32 to vector<8x128xf32>
    %26 = arith.maximumf %24, %25 : vector<8x128xf32>
    %c0_14 = arith.constant 0 : index
    %c0_15 = arith.constant 0 : index
    %27 = vector.load %arg6[%c0_14, %c0_15] : memref<128x128xf32, #tpu.memory_space<vmem>>, vector<128x128xf32>
    %cst_16 = arith.constant dense<0.000000e+00> : vector<8x128xf32>
    %28 = tpu.matmul %26, %27, %cst_16 {dimension_numbers = #tpu.dot_dimension_numbers<[1], [0], [0], [1], [0, 0, 1, 1], [], []>} : vector<8x128xf32>, vector<128x128xf32>, vector<8x128xf32> -> vector<8x128xf32>
    %c0_17 = arith.constant 0 : index
    %c0_18 = arith.constant 0 : index
    %29 = vector.load %arg7[%c0_17, %c0_18] : memref<1x128xf32, #tpu.memory_space<vmem>>, vector<1x128xf32>
    %30 = vector.broadcast %29 : vector<1x128xf32> to vector<8x128xf32>
    %31 = arith.addf %28, %30 : vector<8x128xf32>
    %c0_19 = arith.constant 0 : index
    %c0_20 = arith.constant 0 : index
    %32 = vector.load %arg8[%c0_19, %c0_20] : memref<8x128xf32, #tpu.memory_space<vmem>>, vector<8x128xf32>
    tpu.vector_store %arg8[%c0_19, %c0_20], %31 {strides = array<i32>} : memref<8x128xf32, #tpu.memory_space<vmem>>, vector<8x128xf32>,
    return
  }
  func.func @transform_0(%arg0: i32) -> (i32, i32) {
    %c0_i32 = arith.constant 0 : i32
    %c0_i32_0 = arith.constant 0 : i32
    return %arg0, %c0_i32 : i32, i32
  }
  func.func @transform_1(%arg0: i32) -> (i32, i32) {
    %c0_i32 = arith.constant 0 : i32
    %c0_i32_0 = arith.constant 0 : i32
    return %arg0, %c0_i32 : i32, i32
  }
  func.func @transform_2(%arg0: i32) -> (i32, i32) {
    %c0_i32 = arith.constant 0 : i32
    %c0_i32_0 = arith.constant 0 : i32
    %c0_i32_1 = arith.constant 0 : i32
    return %c0_i32, %c0_i32_0 : i32, i32
  }
  func.func @transform_3(%arg0: i32) -> (i32, i32) {
    %c0_i32 = arith.constant 0 : i32
    %c0_i32_0 = arith.constant 0 : i32
    %c0_i32_1 = arith.constant 0 : i32
    return %c0_i32, %c0_i32_0 : i32, i32
  }
  func.func @transform_4(%arg0: i32) -> (i32, i32) {
    %c0_i32 = arith.constant 0 : i32
    %c0_i32_0 = arith.constant 0 : i32
    %c0_i32_1 = arith.constant 0 : i32
    return %c0_i32, %c0_i32_0 : i32, i32
  }
  func.func @transform_5(%arg0: i32) -> (i32, i32) {
    %c0_i32 = arith.constant 0 : i32
    %c0_i32_0 = arith.constant 0 : i32
    %c0_i32_1 = arith.constant 0 : i32
    return %c0_i32, %c0_i32_0 : i32, i32
  }
  func.func @transform_6(%arg0: i32) -> (i32, i32) {
    %c0_i32 = arith.constant 0 : i32
    %c0_i32_0 = arith.constant 0 : i32
    %c0_i32_1 = arith.constant 0 : i32
    return %c0_i32, %c0_i32_0 : i32, i32
  }
  func.func @transform_7(%arg0: i32) -> (i32, i32) {
    %c0_i32 = arith.constant 0 : i32
    %c0_i32_0 = arith.constant 0 : i32
    return %arg0, %c0_i32 : i32, i32
  }
}

</mosaic_0001>

<bundles_post_ra>
// kernel: tpu_custom_call.1
= control target key start
LH: loop header
LB: loop body
LE: loop exit
PB: predicated region body
PF: predicated region fallthrough
CT: control target
= control target key end

     0   :  { %12 = vsyncpa [#allocation3], 0  ;;  %s746_s0 = inlined_call_operand.hbm [shape: s32[8,8], index: 0, kind: input, shape index: {}]   ;;  %s747_s1 = inlined_call_operand.hbm [shape: f32[8,8], index: 1, kind: input, shape index: {}]   ;;  %s748_s2 = inlined_call_operand.hbm [shape: f32[128,128], index: 2, kind: input, shape index: {}]   ;;  %s749_s3 = inlined_call_operand.hbm [shape: f32[128,128], index: 3, kind: input, shape index: {}]   ;;  %s750_s4 = inlined_call_operand.vmem [shape: f32[1,128], index: 4, kind: input, shape index: {}]   ;;  %s751_s5 = inlined_call_operand.hbm [shape: f32[128,128], index: 5, kind: input, shape index: {}]   ;;  %s752_s6 = inlined_call_operand.vmem [shape: f32[1,128], index: 6, kind: input, shape index: {}]   ;;  %s753_s7 = inlined_call_operand.hbm [shape: f32[8,128], index: 7, kind: output, shape index: {}]  }
   0x1   :  { %13 = vsyncpa [#allocation6], 0 }
   0x2   :  { %14 = vsyncpa [#allocation9], 0  ;;  %s32_s26 = sshll.u32 %s747_s1, 4  ;;  %s33_s26 = int_to_ptr.hbm [resolvable:$true] %s32_s26 }
   0x3   :  { %15 = vsyncpa [#allocation4], 0  ;;  %s653_s27 = smov [#allocation5]   ;;  %s55_s8 = sshll.u32 %s749_s3, 4  ;;  %s56_s8 = int_to_ptr.hbm [resolvable:$true] %s55_s8 }
   0x4   :  { %s34_s28 = sshll.u32 %s653_s27, 4  ;;  %s654_s9 = smov [#allocation8]   ;;  %s35_s28 = int_to_ptr.vmem [resolvable:$true] %s34_s28 }
   0x5   :  { %37 = dma.hbm_to_vmem [thread:$0]  %s33_s26, 128, %s35_s28, [#allocation6]  }
   0x6   :  { %s57_s10 = sshll.u32 %s654_s9, 4  ;;  %s21_s13 = sshll.u32 %s746_s0, 4  ;;  %s58_s10 = int_to_ptr.vmem [resolvable:$true] %s57_s10  ;;  %s22_s13 = int_to_ptr.hbm [resolvable:$true] %s21_s13 }
   0x7   :  { %s655_s1 = smov 128   ;;  %s656_s14 = smov 8  }
   0x8   :  { %63 = dma.hbm_to_vmem [thread:$0]  %s56_s8, 2048, %s58_s10, [#allocation9], %s655_s1, %s655_s1, %s656_s14  }
   0x9   :  { %s42_s17 = sshll.u32 %s748_s2, 4  ;;  %s657_s18 = smov [#allocation2]   ;;  %s43_s17 = int_to_ptr.hbm [resolvable:$true] %s42_s17 }
   0xa   :  { %s23_s19 = sshll.u32 %s657_s18, 4  ;;  %s658_s3 = smov [#allocation7]   ;;  %s24_s19 = int_to_ptr.vmem [resolvable:$true] %s23_s19 }
   0xb   :  { %26 = dma.hbm_to_vmem [thread:$0]  %s22_s13, 128, %s24_s19, [#allocation3]  }
   0xc   :  { %s44_s20 = sshll.u32 %s658_s3, 4  ;;  %s70_s0 = sshll.u32 %s751_s5, 4  ;;  %s45_s20 = int_to_ptr.vmem [resolvable:$true] %s44_s20  ;;  %s71_s0 = int_to_ptr.hbm [resolvable:$true] %s70_s0 }
   0xd   :  { %50 = dma.hbm_to_vmem [thread:$0]  %s43_s17, 2048, %s45_s20, [#allocation6], %s655_s1, %s655_s1, %s656_s14  }
   0xe   :  { %s659_s23 = smov [#allocation10]  }
   0xf   :  { %s72_s24 = sshll.u32 %s659_s23, 4  ;;  %s73_s24 = int_to_ptr.vmem [resolvable:$true] %s72_s24 }
  0x10   :  { %78 = dma.hbm_to_vmem [thread:$0]  %s71_s0, 2048, %s73_s24, [#allocation9], %s655_s1, %s655_s1, %s656_s14  }
  0x11   :  { %645 = dma.done.wait [#allocation3], 128  }
  0x12   :  { %646 = vsyncadd [#allocation3], 4294967168 }
  0x13   :  { %647 = dma.done.wait [#allocation6], 2176  }
  0x14   :  { %648 = vsyncadd [#allocation6], 4294965120 }
  0x15   :  { %649 = dma.done.wait [#allocation9], 4096  }
  0x16   :  { %650 = vsyncadd [#allocation9], 4294963200  ;;  %v103_v0 = vlaneseq  ;;  %v102_v2 = vld [vmem:[#allocation5] sm:$0xff]  ;;  %v101_v3 = vld [vmem:[#allocation2] sm:$0xff]  ;;  %vm356_vm0 = vcmask 64512   ;;  %v660_v40 = vmov 0.0  }
  0x17   :  { %v185_v4 = vperm.slane %v102_v2, 0  ;;  %v119_v5 = vperm.slane %v101_v3, 2  ;;  %v105_v6 = vperm.slane %v101_v3, 0  ;;  %v192_v7 = vperm.slane %v102_v2, 1  ;;  %v312_v21 = vld [vmem:[#allocation7 + $0x78] sm:$0xff]  ;;  %v311_v22 = vld [vmem:[#allocation7 + $0x70] sm:$0xff] }
  0x18   :  { %v107_v1 = vshrl.u32 %v103_v0, 7  ;;  %v126_v8 = vperm.slane %v101_v3, 3  ;;  %v112_v9 = vperm.slane %v101_v3, 1  ;;  %v140_v10 = vperm.slane %v101_v3, 5  ;;  %336 = vmatpush.msra.mxu0 %v312_v21  ;;  %v310_v23 = vld [vmem:[#allocation7 + $0x68] sm:$0xff]  ;;  %v309_v25 = vld [vmem:[#allocation7 + $0x60] sm:$0xff] }
  0x19   :  { %v199_v11 = vperm.slane %v102_v2, 2  ;;  %v133_v12 = vperm.slane %v101_v3, 4  ;;  %v213_v13 = vperm.slane %v102_v2, 4  ;;  %v147_v14 = vperm.slane %v101_v3, 6  ;;  %v308_v28 = vld [vmem:[#allocation7 + $0x58] sm:$0xff]  ;;  %v307_v30 = vld [vmem:[#allocation7 + $0x50] sm:$0xff] }
  0x1a   :  { %496 = vset.pattern.permute.xlu2 %v107_v1  ;;  %495 = vset.pattern.permute.xlu1 %v107_v1  ;;  %v206_v15 = vperm.slane %v102_v2, 3  ;;  %v227_v16 = vperm.slane %v102_v2, 6  ;;  %v220_v17 = vperm.slane %v102_v2, 5  ;;  %v154_v18 = vperm.slane %v101_v3, 7  ;;  %v306_v31 = vld [vmem:[#allocation7 + $0x48] sm:$0xff]  ;;  %v305_v32 = vld [vmem:[#allocation7 + $0x40] sm:$0xff] }
  0x1b   :  { %494 = vset.pattern.permute.xlu0 %v107_v1  ;;  %v234_v19 = vperm.slane %v102_v2, 7  ;;  %337 = vmatpush.msra.mxu0 %v311_v22  ;;  %v357_v29 = vsel %vm356_vm0, %v102_v2, 0.0  ;;  %v304_v36 = vld [vmem:[#allocation7 + $0x38] sm:$0xff]  ;;  %v719_v37 = vand.u32 127, %v103_v0  ;;  %v303_v38 = vld [vmem:[#allocation7 + $0x30] sm:$0xff]  ;;  %v302_v39 = vld [vmem:[#allocation7 + $0x28] sm:$0xff] }
  0x1c   :  { %v301_v42 = vld [vmem:[#allocation7 + $0x20] sm:$0xff]  ;;  %v300_v46 = vld [vmem:[#allocation7 + $0x18] sm:$0xff]  ;;  %v299_v51 = vld [vmem:[#allocation7 + $0x10] sm:$0xff]  ;;  %vm321_vm9 = vcmask 1041409   ;;  %vm323_vm10 = vcmask 1042434   ;;  %vm325_vm11 = vcmask 1043459  }
  0x1d   :  { %338 = vmatpush.msra.mxu0 %v310_v23  ;;  %v298_v53 = vld [vmem:[#allocation7 + $0x8] sm:$0xff]  ;;  %v297_v54 = vld [vmem:[#allocation7] sm:$0xff]  ;;  %vm327_vm12 = vcmask 1044484   ;;  %vm329_vm13 = vcmask 1045509   ;;  %vm331_vm14 = vcmask 1046534   ;;  %vm333_vm15 = vcmask 1047559  }
  0x1e   :  { %s661_s27 = smov [#allocation11]   ;;  %s465_s8 = sshll.u32 %s753_s7, 4  ;;  %s466_s8 = int_to_ptr.hbm [resolvable:$true] %s465_s8 }
  0x1f   :  { %339 = vmatpush.msra.mxu0 %v309_v25  ;;  %s463_s28 = sshll.u32 %s661_s27, 4  ;;  %s464_s28 = int_to_ptr.vmem [resolvable:$true] %s463_s28 }
  0x21   :  { %340 = vmatpush.msra.mxu0 %v308_v28 }
  0x22   :  { %190 = vperm.xlu2 %496, %v185_v4   ;;  %124 = vperm.xlu1 %495, %v119_v5  }
  0x23   :  { %110 = vperm.xlu0 %494, %v105_v6   ;;  %341 = vmatpush.msra.mxu0 %v307_v30 }
  0x25   :  { %342 = vmatpush.msra.mxu0 %v306_v31 }
  0x27   :  { %343 = vmatpush.msra.mxu0 %v305_v32 }
  0x29   :  { %344 = vmatpush.msra.mxu0 %v304_v36 }
  0x2a   :  { %197 = vperm.xlu2 %496, %v192_v7   ;;  %131 = vperm.xlu1 %495, %v126_v8  }
  0x2b   :  { %117 = vperm.xlu0 %494, %v112_v9   ;;  %345 = vmatpush.msra.mxu0 %v303_v38 }
  0x2d   :  { %346 = vmatpush.msra.mxu0 %v302_v39 }
  0x2f   :  { %347 = vmatpush.msra.mxu0 %v301_v42 }
  0x31   :  { %348 = vmatpush.msra.mxu0 %v300_v46 }
  0x32   :  { %145 = vperm.xlu2 %496, %v140_v10   ;;  %204 = vperm.xlu1 %495, %v199_v11  }
  0x33   :  { %138 = vperm.xlu0 %494, %v133_v12   ;;  %349 = vmatpush.msra.mxu0 %v299_v51 }
  0x35   :  { %350 = vmatpush.msra.mxu0 %v298_v53 }
  0x37   :  { %351 = vmatpush.msra.mxu0 %v297_v54 }
  0x3a   :  { %218 = vperm.xlu2 %496, %v213_v13   ;;  %152 = vperm.xlu1 %495, %v147_v14  }
  0x3b   :  { %211 = vperm.xlu0 %494, %v206_v15  }
  0x42   :  { %232 = vperm.xlu2 %496, %v227_v16   ;;  %225 = vperm.xlu1 %495, %v220_v17  }
  0x43   :  { %159 = vperm.xlu0 %494, %v154_v18  }
  0x4b   :  { %239 = vperm.xlu0 %494, %v234_v19  }
  0x6c   :  { %358 = vadd.xlane.f32.xlu1 %v357_v29 }
  0x7c   :  { %v191_v20 = vpop.permute.xlu2 %190 }
  0x84   :  { %v198_v24 = vpop.permute.xlu2 %197 }
  0x8c   :  { %v146_v33 = vpop.permute.xlu2 %145 }
  0x8d   :  { %vm166_vm7 = vcmp.eq.s32.totalorder %v146_v33, %v719_v37 }
  0x8e   :  { %v482_v13 = vsel %vm166_vm7, 1.0, %v660_v40 }
  0x94   :  { %v125_v26 = vpop.permute.xlu1 %124  ;;  %v219_v47 = vpop.permute.xlu2 %218 }
  0x95   :  { %v111_v27 = vpop.permute.xlu0 %110  ;;  %vm163_vm3 = vcmp.eq.s32.totalorder %v125_v26, %v719_v37 }
  0x96   :  { %vm161_vm2 = vcmp.eq.s32.totalorder %v111_v27, %v719_v37  ;;  %v479_v49 = vsel %vm163_vm3, 1.0, %v660_v40 }
  0x97   :  { %v477_v44 = vsel %vm161_vm2, 1.0, %v660_v40 }
  0x98   :  { %v241_v52 = vmul.f32 %v477_v44, %v191_v20 }
  0x9a   :  { %v249_v58 = vrot.slane %v241_v52, 4 }
  0x9c   :  { %v132_v34 = vpop.permute.xlu1 %131  ;;  %v250_v3 = vadd.f32 %v249_v58, %v241_v52  ;;  %v233_v4 = vpop.permute.xlu2 %232 }
  0x9d   :  { %v118_v35 = vpop.permute.xlu0 %117  ;;  %vm164_vm5 = vcmp.eq.s32.totalorder %v132_v34, %v719_v37 }
  0x9e   :  { %vm162_vm1 = vcmp.eq.s32.totalorder %v118_v35, %v719_v37  ;;  %v480_v61 = vsel %vm164_vm5, 1.0, %v660_v40  ;;  %v251_v11 = vrot.slane %v250_v3, 2 }
  0x9f   :  { %v478_v41 = vsel %vm162_vm1, 1.0, %v660_v40 }
  0xa0   :  { %v242_v48 = vmul.f32 %v478_v41, %v198_v24  ;;  %v252_v22 = vadd.f32 %v251_v11, %v250_v3  ;;  %v386_v3 = vld [vmem:[#allocation8 + $0x50] sm:$0xff] }
  0xa1   :  { %v378_v11 = vld [vmem:[#allocation8 + $0x10] sm:$0xff] }
  0xa2   :  { %v255_v55 = vrot.slane %v242_v48, 4  ;;  %v253_v30 = vrot.slane %v252_v22, 1 }
  0xa4   :  { %v205_v43 = vpop.permute.xlu1 %204  ;;  %v256_v63 = vadd.f32 %v255_v55, %v242_v48  ;;  %v254_v42 = vadd.f32 %v253_v30, %v252_v22  ;;  %v427_v22 = vld [vmem:[#allocation10 + $0x50] sm:$0xff]  ;;  %v422_v30 = vld [vmem:[#allocation10 + $0x28] sm:$0xff] }
  0xa5   :  { %v139_v45 = vpop.permute.xlu0 %138  ;;  %v243_v50 = vmul.f32 %v479_v49, %v205_v43 }
  0xa6   :  { %vm165_vm4 = vcmp.eq.s32.totalorder %v139_v45, %v719_v37  ;;  %v257_v8 = vrot.slane %v256_v63, 2 }
  0xa7   :  { %v481_v56 = vsel %vm165_vm4, 1.0, %v660_v40  ;;  %v261_v57 = vrot.slane %v243_v50, 4 }
  0xa8   :  { %v245_v60 = vmul.f32 %v481_v56, %v219_v47  ;;  %v258_v19 = vadd.f32 %v257_v8, %v256_v63  ;;  %v390_v63 = vld [vmem:[#allocation8 + $0x70] sm:$0xff]  ;;  %v381_v8 = vld [vmem:[#allocation8 + $0x28] sm:$0xff] }
  0xa9   :  { %v262_v2 = vadd.f32 %v261_v57, %v243_v50 }
  0xaa   :  { %v273_v6 = vrot.slane %v245_v60, 4  ;;  %v259_v27 = vrot.slane %v258_v19, 1 }
  0xab   :  { %v263_v10 = vrot.slane %v262_v2, 2 }
  0xac   :  { %v153_v59 = vpop.permute.xlu1 %152  ;;  %v274_v15 = vadd.f32 %v273_v6, %v245_v60  ;;  %v260_v38 = vadd.f32 %v259_v27, %v258_v19  ;;  %v383_v6 = vld [vmem:[#allocation8 + $0x38] sm:$0xff]  ;;  %v429_v19 = vld [vmem:[#allocation10 + $0x60] sm:$0xff] }
  0xad   :  { %vm167_vm6 = vcmp.eq.s32.totalorder %v153_v59, %v719_v37  ;;  %v212_v62 = vpop.permute.xlu0 %211  ;;  %v264_v20 = vadd.f32 %v263_v10, %v262_v2  ;;  %v387_v2 = vld [vmem:[#allocation8 + $0x58] sm:$0xff] }
  0xae   :  { %v483_v0 = vsel %vm167_vm6, 1.0, %v660_v40  ;;  %v244_v1 = vmul.f32 %v480_v61, %v212_v62  ;;  %v275_v24 = vrot.slane %v274_v15, 2  ;;  %v322_v47 = vsel %vm321_vm9, %v260_v38, %v254_v42  ;;  %v391_v62 = vld [vmem:[#allocation8 + $0x78] sm:$0xff] }
  0xaf   :  { %v247_v7 = vmul.f32 %v483_v0, %v233_v4  ;;  %v265_v28 = vrot.slane %v264_v20, 1  ;;  %396 = vmatpush.msra.mxu1 %v391_v62  ;;  %v389_v0 = vld [vmem:[#allocation8 + $0x68] sm:$0xff]  ;;  %v379_v10 = vld [vmem:[#allocation8 + $0x18] sm:$0xff] }
  0xb0   :  { %v267_v5 = vrot.slane %v244_v1, 4  ;;  %v276_v32 = vadd.f32 %v275_v24, %v274_v15  ;;  %v385_v4 = vld [vmem:[#allocation8 + $0x48] sm:$0xff]  ;;  %v376_v15 = vld [vmem:[#allocation8] sm:$0xff]  ;;  %v424_v27 = vld [vmem:[#allocation10 + $0x38] sm:$0xff] }
  0xb1   :  { %v285_v16 = vrot.slane %v247_v7, 4  ;;  %v266_v41 = vadd.f32 %v265_v28, %v264_v20  ;;  %397 = vmatpush.msra.mxu1 %v390_v63  ;;  %v428_v20 = vld [vmem:[#allocation10 + $0x58] sm:$0xff]  ;;  %v426_v24 = vld [vmem:[#allocation10 + $0x48] sm:$0xff]  ;;  %v423_v28 = vld [vmem:[#allocation10 + $0x30] sm:$0xff] }
  0xb2   :  { %v268_v9 = vadd.f32 %v267_v5, %v244_v1  ;;  %v388_v1 = vld [vmem:[#allocation8 + $0x60] sm:$0xff] }
  0xb3   :  { %v286_v25 = vadd.f32 %v285_v16, %v247_v7  ;;  %v324_v49 = vsel %vm323_vm10, %v266_v41, %v322_v47  ;;  %398 = vmatpush.msra.mxu1 %v389_v0  ;;  %v384_v5 = vld [vmem:[#allocation8 + $0x40] sm:$0xff]  ;;  %v382_v7 = vld [vmem:[#allocation8 + $0x30] sm:$0xff]  ;;  %v432_v16 = vld [vmem:[#allocation10 + $0x78] sm:$0xff] }
  0xb4   :  { %v269_v12 = vrot.slane %v268_v9, 2  ;;  %v226_v14 = vpop.permute.xlu1 %225  ;;  %437 = vmatpush.msra.mxu2 %v432_v16 }
  0xb5   :  { %v246_v17 = vmul.f32 %v482_v13, %v226_v14  ;;  %v160_v18 = vpop.permute.xlu0 %159  ;;  %v287_v33 = vrot.slane %v286_v25, 2  ;;  %399 = vmatpush.msra.mxu1 %v388_v1  ;;  %v377_v13 = vld [vmem:[#allocation8 + $0x8] sm:$0xff] }
  0xb6   :  { %v270_v23 = vadd.f32 %v269_v12, %v268_v9  ;;  %vm168_vm8 = vcmp.eq.s32.totalorder %v160_v18, %v719_v37  ;;  %v277_v37 = vrot.slane %v276_v32, 1  ;;  %v380_v9 = vld [vmem:[#allocation8 + $0x20] sm:$0xff]  ;;  %v430_v18 = vld [vmem:[#allocation10 + $0x68] sm:$0xff] }
  0xb7   :  { %v279_v21 = vrot.slane %v246_v17, 4  ;;  %v484_v35 = vsel %vm168_vm8, 1.0, %v660_v40  ;;  %v288_v46 = vadd.f32 %v287_v33, %v286_v25  ;;  %400 = vmatpush.msra.mxu1 %v387_v2  ;;  %v425_v25 = vld [vmem:[#allocation10 + $0x40] sm:$0xff] }
  0xb8   :  { %v271_v31 = vrot.slane %v270_v23, 1  ;;  %v278_v40 = vadd.f32 %v277_v37, %v276_v32  ;;  %v497_v37 = vld [vmem:[%s750_s4] ss:$0 sm:$0xff] }
  0xb9   :  { %v280_v26 = vadd.f32 %v279_v21, %v246_v17  ;;  %v289_v53 = vrot.slane %v288_v46, 1  ;;  %401 = vmatpush.msra.mxu1 %v386_v3  ;;  %v431_v17 = vld [vmem:[#allocation10 + $0x70] sm:$0xff] }
  0xba   :  { %v272_v43 = vadd.f32 %v271_v31, %v270_v23  ;;  %438 = vmatpush.msra.mxu2 %v431_v17  ;;  %v421_v31 = vld [vmem:[#allocation10 + $0x20] sm:$0xff] }
  0xbb   :  { %v281_v29 = vrot.slane %v280_v26, 2  ;;  %v290_v58 = vadd.f32 %v289_v53, %v288_v46  ;;  %402 = vmatpush.msra.mxu1 %v385_v4 }
  0xbc   :  { %v326_v52 = vsel %vm325_vm11, %v272_v43, %v324_v49  ;;  %439 = vmatpush.msra.mxu2 %v430_v18  ;;  %v419_v43 = vld [vmem:[#allocation10 + $0x10] sm:$0xff] }
  0xbd   :  { %v282_v34 = vadd.f32 %v281_v29, %v280_v26  ;;  %v240_v36 = vpop.permute.xlu0 %239  ;;  %v328_v55 = vsel %vm327_vm12, %v278_v40, %v326_v52  ;;  %403 = vmatpush.msra.mxu1 %v384_v5  ;;  %v498_v49 = vld [vmem:[%s752_s6] ss:$0 sm:$0xff] }
  0xbe   :  { %v248_v39 = vmul.f32 %v484_v35, %v240_v36  ;;  %440 = vmatpush.msra.mxu2 %v429_v19  ;;  %v420_v35 = vld [vmem:[#allocation10 + $0x18] sm:$0xff] }
  0xbf   :  { %v283_v44 = vrot.slane %v282_v34, 1  ;;  %404 = vmatpush.msra.mxu1 %v383_v6 }
  0xc0   :  { %v291_v45 = vrot.slane %v248_v39, 4  ;;  %441 = vmatpush.msra.mxu2 %v428_v20 }
  0xc1   :  { %v284_v50 = vadd.f32 %v283_v44, %v282_v34  ;;  %405 = vmatpush.msra.mxu1 %v382_v7  ;;  %v418_v44 = vld [vmem:[#allocation10 + $0x8] sm:$0xff] }
  0xc2   :  { %v292_v48 = vadd.f32 %v291_v45, %v248_v39  ;;  %442 = vmatpush.msra.mxu2 %v427_v22  ;;  %v417_v45 = vld [vmem:[#allocation10] sm:$0xff] }
  0xc3   :  { %v330_v57 = vsel %vm329_vm13, %v284_v50, %v328_v55  ;;  %406 = vmatpush.msra.mxu1 %v381_v8 }
  0xc4   :  { %v293_v51 = vrot.slane %v292_v48, 2  ;;  %v332_v60 = vsel %vm331_vm14, %v290_v58, %v330_v57  ;;  %443 = vmatpush.msra.mxu2 %v426_v24 }
  0xc5   :  { %407 = vmatpush.msra.mxu1 %v380_v9 }
  0xc6   :  { %v294_v54 = vadd.f32 %v293_v51, %v292_v48  ;;  %444 = vmatpush.msra.mxu2 %v425_v25 }
  0xc7   :  { %408 = vmatpush.msra.mxu1 %v379_v10 }
  0xc8   :  { %v295_v56 = vrot.slane %v294_v54, 1  ;;  %445 = vmatpush.msra.mxu2 %v424_v27 }
  0xc9   :  { %409 = vmatpush.msra.mxu1 %v378_v11 }
  0xca   :  { %v296_v59 = vadd.f32 %v295_v56, %v294_v54  ;;  %446 = vmatpush.msra.mxu2 %v423_v28 }
  0xcb   :  { %410 = vmatpush.msra.mxu1 %v377_v13 }
  0xcc   :  { %v334_v61 = vsel %vm333_vm15, %v296_v59, %v332_v60  ;;  %447 = vmatpush.msra.mxu2 %v422_v30 }
  0xcd   :  { %352 = vmatmul.f32.vlgmr.msra.gmra.mxu0 %v334_v61  ;;  %411 = vmatpush.msra.mxu1 %v376_v15 }
  0xce   :  { %448 = vmatpush.msra.mxu2 %v421_v31 }
  0xd0   :  { %449 = vmatpush.msra.mxu2 %v420_v35 }
  0xd2   :  { %450 = vmatpush.msra.mxu2 %v419_v43 }
  0xd4   :  { %451 = vmatpush.msra.mxu2 %v418_v44 }
  0xd6   :  { %452 = vmatpush.msra.mxu2 %v417_v45 }
  0xdf   :  { %v359_v12 = vpop.xlane.xlu1 %358 }
  0xe0   :  { %v360_v14 = vmax.f32 %v359_v12, 1.0 }
  0xe2   :  { %499 = vrcp.f32 %v360_v14  ;;  %vm366_vm0 = vweird.f32 %v360_v14  ;;  %v372_v32 = vand.u32 2147483648, %v360_v14  ;;  %v370_v34 = vand.u32 2147483647, %v360_v14 }
  0xe4   :  { %v373_v36 = vor.u32 1.1754944e-38, %v372_v32  ;;  %vm371_vm3 = vcmp.eq.f32.partialorder %v370_v34, 8.507059e+37 }
  0xe8   :  { %v500_v21 = vpop.eup %499 }
  0xe9   :  { %v362_v23 = vmul.f32 %v500_v21, %v360_v14  ;;  %vm367_vm1 = vweird.f32 %v500_v21 }
  0xea   :  { %vm368_vm2 = vmor %vm366_vm0, %vm367_vm1 }
  0xeb   :  { %v363_v26 = vsub.f32 1.0, %v362_v23 }
  0xed   :  { %v364_v29 = vmul.f32 %v500_v21, %v363_v26 }
  0xef   :  { %v365_v33 = vadd.f32 %v500_v21, %v364_v29 }
  0xf1   :  { %v369_v38 = vsel %vm368_vm2, %v500_v21, %v365_v33 }
  0xf2   :  { %v374_v41 = vsel %vm371_vm3, %v373_v36, %v369_v38 }
 0x14a   :  { %v353_v39 = vpop.f32.mrf.mxu0 }
 0x14b   :  { %v375_v42 = vmul.f32 %v374_v41, %v353_v39 }
 0x14d   :  { %412 = vmatmul.f32.vlgmr.msra.gmra.mxu1 %v375_v42 }
 0x1ca   :  { %v413_v46 = vpop.f32.mrf.mxu1 }
 0x1cb   :  { %v414_v47 = vadd.f32 %v497_v37, %v413_v46 }
 0x1cd   :  { %v416_v48 = vmax.f32 %v414_v47, 0.0 }
 0x1cf   :  { %453 = vmatmul.f32.vlgmr.msra.gmra.mxu2 %v416_v48 }
 0x252   :  { %v454_v50 = vpop.f32.mrf.mxu2 }
 0x253   :  { %v455_v51 = vadd.f32 %v498_v49, %v454_v50 }
 0x255   :  { %457 = vst [vmem:[#allocation11] sm:$0xff] %v455_v51 }
 0x256   :  { %468 = dma.vmem_to_hbm [thread:$0]  %s464_s28, 128, %s466_s8, [#allocation4]  }
 0x257   :  { %651 = dma.done.wait [#allocation4], 128  }
 0x258   :  { %652 = vsyncadd [#allocation4], 4294967168 }
 0x259   :  { %473 = vsyncpa [#allocation3], 1 }
 0x25a   :  { %474 = vsyncpa [#allocation6], 1 }
 0x25b   :  { %475 = vsyncpa [#allocation9], 1 }
 0x25c   :  { %476 = vsyncpa [#allocation4], 1 }

</bundles_post_ra>
